<compile_context>
chip_gen: v5e
topology: v5e:2x2
jax: 0.10.0
libtpu: 0.0.40
codegen_flags: <defaults>
</compile_context>

<pallas_src>
import jax
import jax.numpy as jnp
from jax.experimental import pallas as pl
from jax.experimental.pallas import tpu as pltpu
import numpy as np

# ---------------- small, module-consistent shapes ----------------
B       = 2              # batch of image features
VIS_DIM = 32             # clip_model.visual.output_dim
HIDDEN  = VIS_DIM // 16  # meta-net bottleneck (vis_dim // 16)
CTX_DIM = 128            # clip_model.ln_final.weight.shape[0]; 128-lane multiple (real CLIP: 512)
N_CTX   = 2              # cfg.TRAINER.CoDoL.N_CTX
N_DMX   = 2              # cfg.TRAINER.CoDoL.N_DMX
N       = N_CTX + N_DMX
N_CLS   = 8
N_DM    = 2
P       = N_DM * N_CLS   # number of prompts per image (16)
P_TILE  = 8              # prompt-tile size: multiple of 8 -> unmasked sublane rows
L       = 16             # tokenized prompt length (77 in real CLIP; small here)
SUF_LEN = L - 1 - N


def prompt_learner_kernel(bias_ref, ctx_ref, dmx_ref, prefix_ref, suffix_ref, out_ref):
    """One (P_TILE, b) step.

    Lane-flattened (token axis folded into lanes) views:
      bias_ref   : (1, CTX_DIM)             -- per-image meta-net bias (b-dependent block)
      ctx_ref    : (1, N_CTX  * CTX_DIM)    -- shared ctx tokens        (grid-invariant)
      dmx_ref    : (1, N_DMX  * CTX_DIM)    -- shared dmx tokens        (grid-invariant)
      prefix_ref : (P_TILE, 1      * CTX_DIM)  -- per-prompt prefix      (B-invariant)
      suffix_ref : (P_TILE, SUF_LEN* CTX_DIM)  -- per-prompt suffix      (B-invariant)
      out_ref    : (P_TILE, L * CTX_DIM)
    All band offsets/widths below are multiples of 128 lanes -> unmasked stores.
    """
    odt = out_ref.dtype

    # band 0: prefix token (direct copy)
    out_ref[:, 0:CTX_DIM] = prefix_ref[...].astype(odt)

    # bands 1 .. N_CTX: shared ctx tokens, broadcast over the prompt tile
    out_ref[:, CTX_DIM:(1 + N_CTX) * CTX_DIM] = jnp.broadcast_to(
        ctx_ref[...], (P_TILE, N_CTX * CTX_DIM)).astype(odt)

    # bands 1+N_CTX .. 1+N-1: dmx tokens shifted by per-image bias (per-band VPU add)
    bias = bias_ref[...]                                             # (1, CTX_DIM)
    for j in range(N_DMX):
        band = dmx_ref[:, j * CTX_DIM:(j + 1) * CTX_DIM] + bias      # (1, CTX_DIM)
        off = (1 + N_CTX + j) * CTX_DIM
        out_ref[:, off:off + CTX_DIM] = jnp.broadcast_to(
            band, (P_TILE, CTX_DIM)).astype(odt)

    # remaining bands: suffix tokens (direct copy)
    out_ref[:, (1 + N) * CTX_DIM:L * CTX_DIM] = suffix_ref[...].astype(odt)


def prompt_learner_forward(im_features, w1, b1, w2, b2, ctx, dmx, prefix, suffix,
                           out_dtype=jnp.float32):
    # --- meta-net MLP hoisted to XLA (sub-MXU-tile matmuls; never recomputed
    # per grid step).  NOTE: weights here are (in, out); PyTorch nn.Linear
    # stores (out, in), so transpose when porting a real checkpoint.
    h = jnp.maximum(im_features @ w1 + b1, 0.0)                      # (B, HIDDEN)
    bias = (h @ w2 + b2).reshape(B, 1, CTX_DIM)                      # (B, 1, CTX_DIM)

    # Contiguous (free) reshapes: fold the token axis into the lane axis so
    # every band store inside the kernel is a 128-lane-aligned full-vreg write.
    ctx_flat    = ctx.reshape(1, N_CTX * CTX_DIM)
    dmx_flat    = dmx.reshape(1, N_DMX * CTX_DIM)
    prefix_flat = prefix.reshape(P, 1 * CTX_DIM)
    suffix_flat = suffix.reshape(P, SUF_LEN * CTX_DIM)

    # Grid: (P tiles, B) with B innermost so the B-invariant prefix/ctx/dmx/
    # suffix blocks stay resident across the inner B loop (fetched once per
    # P tile).  P axis is "parallel" -> v7x's two TensorCores split the tiles.
    grid = (P // P_TILE, B)

    out_flat = pl.pallas_call(
        prompt_learner_kernel,
        out_shape=jax.ShapeDtypeStruct((B, P, L * CTX_DIM), out_dtype),
        grid_spec=pltpu.PrefetchScalarGridSpec(
            num_scalar_prefetch=0,
            grid=grid,
            in_specs=[
                # bias: only input whose block depends on b
                pl.BlockSpec((None, 1, CTX_DIM),          lambda p, b: (b, 0, 0)),
                # shared learnable contexts: grid-invariant, resident
                pl.BlockSpec((1, N_CTX * CTX_DIM),        lambda p, b: (0, 0)),
                pl.BlockSpec((1, N_DMX * CTX_DIM),        lambda p, b: (0, 0)),
                # per-prompt buffers: depend on the P tile only (B-invariant)
                pl.BlockSpec((P_TILE, CTX_DIM),           lambda p, b: (p, 0)),
                pl.BlockSpec((P_TILE, SUF_LEN * CTX_DIM), lambda p, b: (p, 0)),
            ],
            out_specs=pl.BlockSpec((None, P_TILE, L * CTX_DIM), lambda p, b: (b, p, 0)),
        ),
        compiler_params=pltpu.CompilerParams(
            dimension_semantics=("parallel", "arbitrary"),
            vmem_limit_bytes=32 * 1024 * 1024,   # explicit budget; safe on v5e/v6e/v7x
        ),
    )(bias, ctx_flat, dmx_flat, prefix_flat, suffix_flat)

    # Free contiguous reshape back to the module's (B, P, L, CTX_DIM) layout.
    return out_flat.reshape(B, P, L, CTX_DIM)


def reference(im_features, w1, b1, w2, b2, ctx, dmx, prefix, suffix):
    h = jnp.maximum(im_features @ w1 + b1, 0.0)
    bias = h @ w2 + b2                                        # (B, CTX_DIM)
    dmx_shifted = dmx[None, :, :] + bias[:, None, :]          # (B, N_DMX, CTX_DIM)
    outs = []
    for i in range(B):
        ctx_i = jnp.broadcast_to(ctx[None, None], (N_DM, N_CLS, N_CTX, CTX_DIM))
        dmx_i = jnp.broadcast_to(dmx_shifted[i][None, None], (N_DM, N_CLS, N_DMX, CTX_DIM))
        ctxdmx = jnp.concatenate([ctx_i, dmx_i], axis=2).reshape(P, N, CTX_DIM)
        pts = jnp.concatenate([prefix, ctxdmx, suffix], axis=1)
        outs.append(pts)
    return jnp.stack(outs)


if __name__ == "__main__":
    key = jax.random.PRNGKey(0)
    keys = jax.random.split(key, 9)

    im_features = jax.random.normal(keys[0], (B, VIS_DIM), jnp.float32)
    # meta-net params (deterministic synthetic init; (in, out) layout)
    w1 = jax.random.normal(keys[1], (VIS_DIM, HIDDEN), jnp.float32) * 0.02
    b1 = jax.random.normal(keys[2], (1, HIDDEN), jnp.float32) * 0.02
    w2 = jax.random.normal(keys[3], (HIDDEN, CTX_DIM), jnp.float32) * 0.02
    b2 = jax.random.normal(keys[4], (1, CTX_DIM), jnp.float32) * 0.02
    # learnable contexts (nn.init.normal_(std=0.02))
    ctx = jax.random.normal(keys[5], (N_CTX, CTX_DIM), jnp.float32) * 0.02
    dmx = jax.random.normal(keys[6], (N_DMX, CTX_DIM), jnp.float32) * 0.02
    # token_prefix / token_suffix buffers (stand-ins for CLIP token embeddings)
    prefix = jax.random.normal(keys[7], (P, 1, CTX_DIM), jnp.float32)
    suffix = jax.random.normal(keys[8], (P, SUF_LEN, CTX_DIM), jnp.float32)

    out = prompt_learner_forward(im_features, w1, b1, w2, b2, ctx, dmx, prefix, suffix)
    out = jax.block_until_ready(out)

    ref = reference(im_features, w1, b1, w2, b2, ctx, dmx, prefix, suffix)
    np.testing.assert_allclose(np.asarray(out), np.asarray(ref), rtol=1e-5, atol=1e-5)

    print("KERNEL_OK")
</pallas_src>

<mosaic_0001>
module attributes {stable_mosaic.version = 11 : i64} {
  func.func @prompt_learner_kernel(%arg0: i32, %arg1: i32, %arg2: memref<1x1x128xf32, #tpu.memory_space<vmem>>, %arg3: memref<1x256xf32, #tpu.memory_space<vmem>>, %arg4: memref<1x256xf32, #tpu.memory_space<vmem>>, %arg5: memref<8x128xf32, #tpu.memory_space<vmem>>, %arg6: memref<8x1408xf32, #tpu.memory_space<vmem>>, %arg7: memref<1x8x2048xf32, #tpu.memory_space<vmem>>) attributes {dimension_semantics = [#tpu.dimension_semantics<parallel>, #tpu.dimension_semantics<arbitrary>], iteration_bounds = array<i64: 2, 2>, scalar_prefetch = 0 : i64, scratch_operands = 0 : i64, tpu.core_type = #tpu.core_type<tc>, window_params = [{transform_indices = @transform_0, window_bounds = array<i64: 1, 1, 128>}, {pipeline_mode = #tpu.pipeline_mode<synchronous>, transform_indices = @transform_1, window_bounds = array<i64: 1, 256>}, {pipeline_mode = #tpu.pipeline_mode<synchronous>, transform_indices = @transform_2, window_bounds = array<i64: 1, 256>}, {transform_indices = @transform_3, window_bounds = array<i64: 8, 128>}, {transform_indices = @transform_4, window_bounds = array<i64: 8, 1408>}, {transform_indices = @transform_5, window_bounds = array<i64: 1, 8, 2048>}]} {
    %c0 = arith.constant 0 : index
    %c0_0 = arith.constant 0 : index
    %0 = vector.load %arg5[%c0, %c0_0] : memref<8x128xf32, #tpu.memory_space<vmem>>, vector<8x128xf32>
    %c0_1 = arith.constant 0 : index
    %c0_2 = arith.constant 0 : index
    %c0_3 = arith.constant 0 : index
    %1 = vector.load %arg7[%c0_1, %c0_2, %c0_3] : memref<1x8x2048xf32, #tpu.memory_space<vmem>>, vector<1x8x128xf32>
    %2 = vector.shape_cast %1 : vector<1x8x128xf32> to vector<8x128xf32>
    %3 = vector.shape_cast %0 : vector<8x128xf32> to vector<1x8x128xf32>
    tpu.vector_store %arg7[%c0_1, %c0_2, %c0_3], %3 {strides = array<i32>} : memref<1x8x2048xf32, #tpu.memory_space<vmem>>, vector<1x8x128xf32>,
    %c0_4 = arith.constant 0 : index
    %c0_5 = arith.constant 0 : index
    %4 = vector.load %arg3[%c0_4, %c0_5] : memref<1x256xf32, #tpu.memory_space<vmem>>, vector<1x256xf32>
    %5 = vector.shape_cast %4 : vector<1x256xf32> to vector<1x256xf32>
    %6 = vector.broadcast %5 : vector<1x256xf32> to vector<8x256xf32>
    %c0_6 = arith.constant 0 : index
    %c0_7 = arith.constant 0 : index
    %c128 = arith.constant 128 : index
    %7 = vector.load %arg7[%c0_6, %c0_7, %c128] : memref<1x8x2048xf32, #tpu.memory_space<vmem>>, vector<1x8x256xf32>
    %8 = vector.shape_cast %7 : vector<1x8x256xf32> to vector<8x256xf32>
    %9 = vector.shape_cast %6 : vector<8x256xf32> to vector<1x8x256xf32>
    tpu.vector_store %arg7[%c0_6, %c0_7, %c128], %9 {strides = array<i32>} : memref<1x8x2048xf32, #tpu.memory_space<vmem>>, vector<1x8x256xf32>,
    %c0_8 = arith.constant 0 : index
    %c0_9 = arith.constant 0 : index
    %c0_10 = arith.constant 0 : index
    %10 = vector.load %arg2[%c0_8, %c0_9, %c0_10] : memref<1x1x128xf32, #tpu.memory_space<vmem>>, vector<1x1x128xf32>
    %11 = vector.shape_cast %10 : vector<1x1x128xf32> to vector<1x128xf32>
    %c0_11 = arith.constant 0 : index
    %c0_12 = arith.constant 0 : index
    %12 = vector.load %arg4[%c0_11, %c0_12] : memref<1x256xf32, #tpu.memory_space<vmem>>, vector<1x128xf32>
    %13 = arith.addf %12, %11 : vector<1x128xf32>
    %14 = vector.shape_cast %13 : vector<1x128xf32> to vector<1x128xf32>
    %15 = vector.broadcast %14 : vector<1x128xf32> to vector<8x128xf32>
    %c0_13 = arith.constant 0 : index
    %c0_14 = arith.constant 0 : index
    %c384 = arith.constant 384 : index
    %16 = vector.load %arg7[%c0_13, %c0_14, %c384] : memref<1x8x2048xf32, #tpu.memory_space<vmem>>, vector<1x8x128xf32>
    %17 = vector.shape_cast %16 : vector<1x8x128xf32> to vector<8x128xf32>
    %18 = vector.shape_cast %15 : vector<8x128xf32> to vector<1x8x128xf32>
    tpu.vector_store %arg7[%c0_13, %c0_14, %c384], %18 {strides = array<i32>} : memref<1x8x2048xf32, #tpu.memory_space<vmem>>, vector<1x8x128xf32>,
    %c0_15 = arith.constant 0 : index
    %c128_16 = arith.constant 128 : index
    %19 = vector.load %arg4[%c0_15, %c128_16] : memref<1x256xf32, #tpu.memory_space<vmem>>, vector<1x128xf32>
    %20 = arith.addf %19, %11 : vector<1x128xf32>
    %21 = vector.shape_cast %20 : vector<1x128xf32> to vector<1x128xf32>
    %22 = vector.broadcast %21 : vector<1x128xf32> to vector<8x128xf32>
    %c0_17 = arith.constant 0 : index
    %c0_18 = arith.constant 0 : index
    %c512 = arith.constant 512 : index
    %23 = vector.load %arg7[%c0_17, %c0_18, %c512] : memref<1x8x2048xf32, #tpu.memory_space<vmem>>, vector<1x8x128xf32>
    %24 = vector.shape_cast %23 : vector<1x8x128xf32> to vector<8x128xf32>
    %25 = vector.shape_cast %22 : vector<8x128xf32> to vector<1x8x128xf32>
    tpu.vector_store %arg7[%c0_17, %c0_18, %c512], %25 {strides = array<i32>} : memref<1x8x2048xf32, #tpu.memory_space<vmem>>, vector<1x8x128xf32>,
    %c0_19 = arith.constant 0 : index
    %c0_20 = arith.constant 0 : index
    %26 = vector.load %arg6[%c0_19, %c0_20] : memref<8x1408xf32, #tpu.memory_space<vmem>>, vector<8x1408xf32>
    %c0_21 = arith.constant 0 : index
    %c0_22 = arith.constant 0 : index
    %c640 = arith.constant 640 : index
    %27 = vector.load %arg7[%c0_21, %c0_22, %c640] : memref<1x8x2048xf32, #tpu.memory_space<vmem>>, vector<1x8x1408xf32>
    %28 = vector.shape_cast %27 : vector<1x8x1408xf32> to vector<8x1408xf32>
    %29 = vector.shape_cast %26 : vector<8x1408xf32> to vector<1x8x1408xf32>
    tpu.vector_store %arg7[%c0_21, %c0_22, %c640], %29 {strides = array<i32>} : memref<1x8x2048xf32, #tpu.memory_space<vmem>>, vector<1x8x1408xf32>,
    return
  }
  func.func @transform_0(%arg0: i32, %arg1: i32) -> (i32, i32, i32) {
    %c0_i32 = arith.constant 0 : i32
    %c0_i32_0 = arith.constant 0 : i32
    %c0_i32_1 = arith.constant 0 : i32
    return %arg1, %c0_i32, %c0_i32_0 : i32, i32, i32
  }
  func.func @transform_1(%arg0: i32, %arg1: i32) -> (i32, i32) {
    %c0_i32 = arith.constant 0 : i32
    %c0_i32_0 = arith.constant 0 : i32
    %c0_i32_1 = arith.constant 0 : i32
    return %c0_i32, %c0_i32_0 : i32, i32
  }
  func.func @transform_2(%arg0: i32, %arg1: i32) -> (i32, i32) {
    %c0_i32 = arith.constant 0 : i32
    %c0_i32_0 = arith.constant 0 : i32
    %c0_i32_1 = arith.constant 0 : i32
    return %c0_i32, %c0_i32_0 : i32, i32
  }
  func.func @transform_3(%arg0: i32, %arg1: i32) -> (i32, i32) {
    %c0_i32 = arith.constant 0 : i32
    %c0_i32_0 = arith.constant 0 : i32
    return %arg0, %c0_i32 : i32, i32
  }
  func.func @transform_4(%arg0: i32, %arg1: i32) -> (i32, i32) {
    %c0_i32 = arith.constant 0 : i32
    %c0_i32_0 = arith.constant 0 : i32
    return %arg0, %c0_i32 : i32, i32
  }
  func.func @transform_5(%arg0: i32, %arg1: i32) -> (i32, i32, i32) {
    %c0_i32 = arith.constant 0 : i32
    %c0_i32_0 = arith.constant 0 : i32
    return %arg1, %arg0, %c0_i32 : i32, i32, i32
  }
}

</mosaic_0001>

<bundles_post_ra>
// kernel: tpu_custom_call.1
= control target key start
LH: loop header
LB: loop body
LE: loop exit
PB: predicated region body
PF: predicated region fallthrough
CT: control target
= control target key end

     0   :  { %s1405_s0 = inlined_call_operand.hbm [shape: f32[2,1,128], index: 0, kind: input, shape index: {}]   ;;  %s1406_s1 = inlined_call_operand.hbm [shape: f32[1,256], index: 1, kind: input, shape index: {}]   ;;  %s1407_s2 = inlined_call_operand.hbm [shape: f32[1,256], index: 2, kind: input, shape index: {}]   ;;  %s1408_s3 = inlined_call_operand.hbm [shape: f32[16,128], index: 3, kind: input, shape index: {}]   ;;  %s1409_s4 = inlined_call_operand.hbm [shape: f32[16,1408], index: 4, kind: input, shape index: {}]   ;;  %s1410_s5 = inlined_call_operand.hbm [shape: f32[2,16,2048], index: 5, kind: output, shape index: {}]  }
   0x1   :  { %1424 = sst [smem:[#allocation27_spill]] %s1406_s1 }
   0x2   :  { %1425 = sst [smem:[#allocation28_spill]] %s1407_s2 }
   0x3   :  { %1426 = sst [smem:[#allocation29_spill]] %s1408_s3 }
   0x4   :  { %1427 = sst [smem:[#allocation30_spill]] %s1410_s5 }
   0x5   :  { %10 = vsyncpa [#allocation3], 0 }
   0x6   :  { %12 = vsyncpa [#allocation3 + $0x1], 0 }
   0x7   :  { %13 = vsyncpa [#allocation6], 0 }
   0x8   :  { %14 = vsyncpa [#allocation9], 0 }
   0x9   :  { %16 = vsyncpa [#allocation9 + $0x1], 0 }
   0xa   :  { %17 = vsyncpa [#allocation4], 0 }
   0xb   :  { %19 = vsyncpa [#allocation4 + $0x1], 0  ;;  %s1081_s18 = smov 0   ;;  %s1083_s19 = smov 0  }
   0xc   :  { %s1085_s20 = smov 0   ;;  %s1087_s21 = smov 0  }
   0xd   :  { %s1089_s22 = smov 0   ;;  %s1091_s23 = smov 0  }
   0xe   :  { %s1093_s24 = smov 0   ;;  %s1095_s25 = smov 0  }
   0xf   :  { %s1097_s26 = smov 0   ;;  %s1099_s27 = smov 0  }
  0x10   :  { %s1101_s28 = smov 0   ;;  %s1103_s29 = smov 0  }
  0x11   :  { %s1105_s30 = smov 0   ;;  %s1107_s6 = smov 0  }
  0x12 LB: > { %1428 = sst [smem:[#allocation16_spill]] %s995_s18  ;;  %s1152_s7 = sadd.s32 4294967295, %s1047_s6   ;;  %s1047_s6 = sphi %s1107_s6, %s25_s6   ;;  %s1043_s30 = sphi %s1105_s30, %s1480_s30   ;;  %s1039_s29 = sphi %s1103_s29, %s1479_s29   ;;  %s1035_s28 = sphi %s1101_s28, %s1478_s28   ;;  %s1031_s27 = sphi %s1099_s27, %s1477_s27   ;;  %s1027_s26 = sphi %s1097_s26, %s1476_s26   ;;  %s1023_s25 = sphi %s1095_s25, %s1475_s25   ;;  %s1019_s24 = sphi %s1093_s24, %s1474_s24   ;;  %s1015_s23 = sphi %s1091_s23, %s1473_s23   ;;  %s1011_s22 = sphi %s1089_s22, %s1472_s22   ;;  %s1007_s21 = sphi %s1087_s21, %s1464_s21   ;;  %s1003_s20 = sphi %s1085_s20, %s1471_s20   ;;  %s999_s19 = sphi %s1083_s19, %s1470_s19   ;;  %s995_s18 = sphi %s1081_s18, %s1469_s18  }
  0x13   : > { %1429 = sst [smem:[#allocation17_spill]] %s999_s19  ;;  %s564_s8 = sadd.s32 4294967294, %s1047_s6  }
  0x14   : > { %1430 = sst [smem:[#allocation18_spill]] %s1011_s22  ;;  %p58_p0 = scmp.eq.s32.totalorder %s1152_s7, 0 }
  0x15   : > { %1431 = sst [smem:[#allocation19_spill]] %s1031_s27  ;;  %p176_p1 = scmp.ne.s32.totalorder %s1003_s20, %s999_s19 }
  0x16   : > { %1432 = sst [smem:[#allocation20_spill]] %s1035_s28  ;;  %p177_p2 = scmp.eq.s32.totalorder %s1152_s7, 3 }
  0x17   : > { %p182_p3 = scmp.ne.s32.totalorder %s999_s19, %s995_s18  ;;  %p183_p4 = scmp.eq.s32.totalorder %s564_s8, 3 }
  0x18   : > { %p565_p5 = scmp.ge.s32.totalorder %s1047_s6, 1  ;;  %p1162_p6 = por %p177_p2, %p176_p1 }
  0x19   : > { %p190_p7 = scmp.lt.s32.totalorder %s1047_s6, 5  ;;  %p1167_p8 = por %p183_p4, %p182_p3 }
  0x1a   : > { %s1433_s9 = scalar_select %p1162_p6, 1, 0 }
  0x1b   : > { %s1435_s10 = scalar_select %p1167_p8, 1, 0 }
  0x1c   : > { %1434 = sst [smem:[#allocation21_spill]] %s1433_s9  ;;  %p1171_p9 = pnand %p565_p5, %p190_p7 }
  0x1d   : > { %1436 = sst [smem:[#allocation22_spill]] %s1435_s10  ;;  %s1049_s15 = smov [#allocation5]  }
  0x1e   : > { %s1438_s1 = sld [smem:[#allocation27_spill]]  ;;  %p602_p10 = pneg %p1171_p9 }
  0x1f   : > { %s204_s16 = sshll.u32 %s1049_s15, 4  ;;  %p52_p12 = scmp.eq.s32.totalorder %s1047_s6, 0  ;;  %s205_s16 = int_to_ptr.vmem [resolvable:$true] %s204_s16 }
  0x20   : > { %p1182_p11 = pnand %p602_p10, %p58_p0  ;;  %p119_p13 = scmp.ne.s32.totalorder %s1015_s23, %s1011_s22 }
  0x21   : > { %p125_p1 = scmp.ne.s32.totalorder %s1011_s22, %s1007_s21  ;;  %p1416_p2 = scmp.lt.s32.totalorder %s1047_s6, 4 }
  0x22   : > { %s244_s12 = sand.u32 1, %s1047_s6   ;;  %p121_p3 = por %p119_p13, %p52_p12 }
  0x23   : > { %p1200_p4 = por %p125_p1, %p58_p0  ;;  %s246_s15 = sand.u32 1, %s1015_s23  }
  0x24   : > { %s202_s14 = sshll.u32 %s1438_s1, 4  ;;  %s569_s1 = sshll.u32 %s246_s15, 3  ;;  %s203_s14 = int_to_ptr.hbm [resolvable:$true] %s202_s14 }
  0x25   : > { %605 = dma.hbm_to_vmem [thread:$0]  (!%p1182_p11), %s203_s14, 32, %s205_s16, [#allocation6]  }
  0x26   : > { %s1440_s13 = scalar_select %p1200_p4, 1, 0 }
  0x27   : > { %s570_s10 = sshll.u32 %s1043_s30, 3  ;;  %s1442_s3 = sld [smem:[#allocation29_spill]] }
  0x28   : > { %1441 = sst [smem:[#allocation23_spill]] %s1440_s13  ;;  %s248_s21 = scalar_lea.vmem [#allocation8], %s569_s1 }
  0x29   : > { %s256_s8 = sshll.u32 %s248_s21, 4  ;;  %p1211_p5 = pnand %p1416_p2, %p121_p3  ;;  %s257_s8 = int_to_ptr.vmem [resolvable:$true] %s256_s8 }
  0x2a   : > { %s1215_s18 = smul.u32 88, %s246_s15  ;;  %s1444_s2 = sld [smem:[#allocation28_spill]] }
  0x2b   : > { %s1050_s21 = smov [#allocation7]   ;;  %s34_s15 = sadd.s32 1, %s1039_s29 }
  0x2c   : > { %s37_s9 = sadd.s32 1, %s1043_s30  ;;  %p35_p7 = scmp.ge.s32.totalorder %s34_s15, 2 }
  0x2d   : > { %s252_s14 = scalar_lea.hbm %s1442_s3, %s570_s10  ;;  %s216_s3 = sshll.u32 %s1050_s21, 4  ;;  %s217_s3 = int_to_ptr.vmem [resolvable:$true] %s216_s3 }
  0x2e   : > { %s254_s16 = sshll.u32 %s252_s14, 4  ;;  %s1220_s14 = scalar_lea.sflag [#allocation9], %s244_s12  ;;  %s255_s16 = int_to_ptr.hbm [resolvable:$true] %s254_s16 }
  0x2f   : > { %615 = dma.hbm_to_vmem [thread:$0]  (!%p1211_p5), %s255_s16, 128, %s257_s8, %s1220_s14  }
  0x30   : > { %s214_s1 = sshll.u32 %s1444_s2, 4  ;;  %s44_s10 = sadd.s32 1, %s1027_s26  ;;  %s215_s1 = int_to_ptr.hbm [resolvable:$true] %s214_s1 }
  0x31   : > { %608 = dma.hbm_to_vmem [thread:$0]  (!%p1182_p11), %s215_s1, 32, %s217_s3, [#allocation6]  }
  0x32   : > { %p51_p10 = scmp.ne.s32.totalorder %s1027_s26, %s1023_s25  ;;  %p57_p13 = scmp.ne.s32.totalorder %s1023_s25, %s1019_s24 }
  0x33   : > { %s1482_s15 = smov (%p35_p7, %s34_s15), 0  ;;  %s1484_s9 = smov (!%p35_p7, %s37_s9), %s1043_s30 }
  0x34   : > { %1445 = sst [smem:[#allocation24_spill]] %s1482_s15  ;;  %s41_s8 = ssub.s32 %s1039_s29, %s1482_s15 }
  0x35   : > { %p1241_p11 = por %p52_p12, %p51_p10  ;;  %p39_p1 = scmp.ge.s32.totalorder %s1484_s9, 2 }
  0x36   : > { %p42_p3 = scmp.eq.s32.totalorder %s41_s8, 0  ;;  %p1247_p2 = por %p58_p0, %p57_p13 }
  0x37   : > { %s166_s24 = sadd.s32 1, %s1003_s20  ;;  %s1486_s9 = smov (%p39_p1, %s1484_s9), 0 }
  0x38   : > { %1448 = sst [smem:[#allocation25_spill]] %s1486_s9  ;;  %s109_s16 = ssub.s32 %s1043_s30, %s1486_s9 }
  0x39   : > { %s1255_s12 = scalar_select %p42_p3, %s1027_s26, %s44_s10  }
  0x3a   : > { %s227_s1 = sand.u32 1, %s1027_s26   ;;  %p110_p12 = scmp.eq.s32.totalorder %s109_s16, 0 }
  0x3b   : > { %1449 = sst [smem:[#allocation26_spill]] %s1255_s12  ;;  %s163_s21 = sor.u32 %s109_s16, %s41_s8 }
  0x3c   : > { %p164_p7 = scmp.eq.s32.totalorder %s163_s21, 0  ;;  %s1450_s2 = sadd.s32 1, %s1015_s23 }
  0x3d   : > { %s1263_s15 = scalar_select %p110_p12, %s1015_s23, %s1450_s2  }
  0x3e   : > { %s1266_s27 = scalar_select %p164_p7, %s1003_s20, %s166_s24  }
  0x3f   : > { %s233_s13 = scalar_lea.hbm %s1405_s0, %s1039_s29  ;;  %s230_s10 = scalar_lea.vmem [#allocation2], %s227_s1 }
  0x40   : > { %s235_s22 = sshll.u32 %s233_s13, 4  ;;  %s237_s12 = sshll.u32 %s230_s10, 4  ;;  %s236_s22 = int_to_ptr.hbm [resolvable:$true] %s235_s22  ;;  %s238_s12 = int_to_ptr.vmem [resolvable:$true] %s237_s12 }
  0x41   : > { %p1451_p10 = scmp.lt.s32.totalorder %s1047_s6, 4  ;;  %s584_s8 = smul.u32 88, %s1043_s30 }
  0x42   : > { %s267_s16 = scalar_lea.vmem [#allocation10], %s1215_s18  ;;  %s228_s21 = scalar_lea.sflag [#allocation3], %s227_s1 }
  0x43   : > { %p610_p13 = pnand %p1451_p10, %p1241_p11  ;;  %s276_s2 = sshll.u32 %s267_s16, 4  ;;  %s277_s2 = int_to_ptr.vmem [resolvable:$true] %s276_s2 }
  0x44   : > { %s272_s19 = scalar_lea.hbm %s1409_s4, %s584_s8  ;;  %285 = sbr.rel (%p1171_p9) target bundleno = 113 (0x71), region = 40 }
  0x45   : > { %612 = dma.hbm_to_vmem [thread:$0]  (!%p610_p13), %s236_s22, 16, %s238_s12, %s228_s21  }
  0x46   : > { %s274_s28 = sshll.u32 %s272_s19, 4  ;;  %s287_s13 = sand.u32 (!%p1171_p9), 1, %s1023_s25   ;;  %s275_s28 = int_to_ptr.hbm [resolvable:$true] %s274_s28 }
  0x47   : > { %618 = dma.hbm_to_vmem [thread:$0]  (!%p1211_p5), %s275_s28, 1408, %s277_s2, %s1220_s14  }
  0x48   : > { %s288_s3 = scalar_lea.sflag (!%p1171_p9), [#allocation3], %s287_s13  ;;  %s290_s18 = scalar_lea.vmem (!%p1171_p9), [#allocation2], %s287_s13 }
  0x49   : > { %978 = dma.done.wait (%p1247_p2), %s288_s3, 16  }
  0x4a   : > { %980 = vsyncadd (%p1247_p2), %s288_s3, 4294967280 }
  0x4b   : > { %982 = dma.done.wait (%p58_p0), [#allocation6], 64  }
  0x4c   : > { %984 = vsyncadd (%p58_p0), [#allocation6], 4294967232  ;;  %s1452_s5 = sld [smem:[#allocation18_spill]]  ;;  %s306_s11 = sand.u32 1, %s1152_s7  }
  0x4d   : > { %s307_s12 = scalar_lea.sflag [#allocation9], %s306_s11 }
  0x52   : > { %s308_s14 = sand.u32 1, %s1452_s5  }
  0x53   : > { %s575_s9 = sshll.u32 %s308_s14, 3 }
  0x54   : > { %s310_s1 = scalar_lea.vmem [#allocation8], %s575_s9 }
  0x55   : > { %986 = dma.done.wait (%p1200_p4), %s307_s12, 1536  }
  0x56   : > { %988 = vsyncadd (%p1200_p4), %s307_s12, 4294965760  ;;  %s1454_s17 = sld [smem:[#allocation17_spill]]  ;;  %s585_s21 = smul.u32 88, %s308_s14  ;;  %v357_v0 = vld [vmem:[%s310_s1] sm:$0xff]  ;;  %v359_v1 = vld [vmem:[#allocation5] sm:$0x3] }
  0x57   : > { %s1455_s10 = sld [smem:[#allocation20_spill]]  ;;  %v367_v2 = vld [vmem:[%s290_s18] sm:$0x1]  ;;  %v361_v3 = vperm.slane %v359_v1, 0  ;;  %v362_v4 = vperm.slane %v359_v1, 1 }
  0x58   : > { %s1456_s8 = sld [smem:[#allocation19_spill]]  ;;  %v368_v5 = vld [vmem:[#allocation7] sm:$0x1]  ;;  %v374_v6 = vld [vmem:[#allocation7 + $0x1] sm:$0x1]  ;;  %s1309_s28 = scalar_lea.vmem [#allocation10], %s585_s21 }
  0x59   : > { %v369_v7 = vadd.f32 %v368_v5, %v367_v2  ;;  %v375_v8 = vadd.f32 %v374_v6, %v367_v2  ;;  %v380_v9 = vld [vmem:[%s1309_s28] sm:$0xff]  ;;  %v381_v12 = vld [vmem:[%s1309_s28 + $0x8] sm:$0xff]  ;;  %v382_v13 = vld [vmem:[%s1309_s28 + $0x10] sm:$0xff]  ;;  %s1457_s22 = sld [smem:[#allocation30_spill]] }
  0x5a   : > { %v383_v14 = vld [vmem:[%s1309_s28 + $0x18] sm:$0xff]  ;;  %v384_v15 = vld [vmem:[%s1309_s28 + $0x20] sm:$0xff]  ;;  %v385_v16 = vld [vmem:[%s1309_s28 + $0x28] sm:$0xff] }
  0x5b   : > { %v371_v10 = vperm.slane %v369_v7, 0  ;;  %v377_v11 = vperm.slane %v375_v8, 0  ;;  %v386_v17 = vld [vmem:[%s1309_s28 + $0x30] sm:$0xff]  ;;  %v387_v18 = vld [vmem:[%s1309_s28 + $0x38] sm:$0xff]  ;;  %v388_v19 = vld [vmem:[%s1309_s28 + $0x40] sm:$0xff] }
  0x5c   : > { %s354_s16 = sand.u32 1, %s1454_s17   ;;  %v389_v20 = vld [vmem:[%s1309_s28 + $0x48] sm:$0xff]  ;;  %v390_v21 = vld [vmem:[%s1309_s28 + $0x50] sm:$0xff] }
  0x5d   : > { %s576_s2 = sshll.u32 %s354_s16, 7  ;;  %s578_s24 = sshll.u32 %s1455_s10, 4 }
  0x5e   : > { %s579_s7 = sshll.u32 %s1456_s8, 5  ;;  %s1306_s19 = scalar_lea.vmem [#allocation11], %s576_s2 }
  0x5f   : > { %358 = vst [vmem:[%s1306_s19] sm:$0xff] %v357_v0  ;;  %s414_s13 = sadd.s32 %s579_s7, %s578_s24  ;;  %s1458_s11 = smov %s1457_s22 }
  0x60   : > { %365 = vst [vmem:[%s1306_s19 + $0x8] sm:$0xff] %v361_v3  ;;  %s580_s3 = sshll.u32 %s414_s13, 3  ;;  %s418_s9 = sshll.u32 %s1306_s19, 4  ;;  %s419_s9 = int_to_ptr.vmem [resolvable:$true] %s418_s9 }
  0x61   : > { %366 = vst [vmem:[%s1306_s19 + $0x10] sm:$0xff] %v362_v4  ;;  %s416_s14 = scalar_lea.hbm %s1457_s22, %s580_s3  ;;  %s403_s10 = scalar_lea.sflag [#allocation4], %s354_s16 }
  0x62   : > { %391 = vst [vmem:[%s1306_s19 + $0x28] sm:$0xff] %v380_v9  ;;  %s420_s1 = sshll.u32 %s416_s14, 4  ;;  %s913_s7 = scalar_lea.hbm %s1458_s11, 512  ;;  %s421_s1 = int_to_ptr.hbm [resolvable:$true] %s420_s1 }
  0x63   : > { %373 = vst [vmem:[%s1306_s19 + $0x18] sm:$0xff] %v371_v10  ;;  %s907_s8 = sshra.s32 %s421_s1, 4  ;;  %s908_s8 = int_to_ptr.hbm [resolvable:$true] %s907_s8 }
  0x64   : > { %379 = vst [vmem:[%s1306_s19 + $0x20] sm:$0xff] %v377_v11  ;;  %s909_s2 = scalar_lea.hbm %s908_s8, 128  ;;  %p914_p4 = scmp.lt.s32.totalorder %s908_s8, %s1458_s11 }
  0x65   : > { %392 = vst [vmem:[%s1306_s19 + $0x30] sm:$0xff] %v381_v12  ;;  %p910_p0 = scmp.ne.s32.totalorder %s908_s8, %s909_s2  ;;  %p915_p5 = scmp.lt.s32.totalorder %s913_s7, %s909_s2 }
  0x66   : > { %393 = vst [vmem:[%s1306_s19 + $0x38] sm:$0xff] %v382_v13 }
  0x67   : > { %394 = vst [vmem:[%s1306_s19 + $0x40] sm:$0xff] %v383_v14  ;;  %p911_p9 = pnand %p910_p0, %p1162_p6  ;;  %p916_p11 = por %p915_p5, %p914_p4 }
  0x68   : > { %395 = vst [vmem:[%s1306_s19 + $0x48] sm:$0xff] %v384_v15 }
  0x69   : > { %396 = vst [vmem:[%s1306_s19 + $0x50] sm:$0xff] %v385_v16  ;;  %p912_p2 = pneg %p911_p9 }
  0x6a   : > { %397 = vst [vmem:[%s1306_s19 + $0x58] sm:$0xff] %v386_v17 }
  0x6b   : > { %398 = vst [vmem:[%s1306_s19 + $0x60] sm:$0xff] %v387_v18  ;;  %p917_p1 = pnand %p916_p11, %p912_p2 }
  0x6c   : > { %399 = vst [vmem:[%s1306_s19 + $0x68] sm:$0xff] %v388_v19 }
  0x6d   : > { %400 = vst [vmem:[%s1306_s19 + $0x70] sm:$0xff] %v389_v20 }
  0x6e   : > { %401 = vst [vmem:[%s1306_s19 + $0x78] sm:$0xff] %v390_v21 }
  0x6f   : > { %920 = shalt.err (!%p917_p1)
}
  0x70   : > { %600 = dma.vmem_to_hbm [thread:$0]  (%p1162_p6), %s419_s9, 2048, %s421_s1, %s403_s10  }
  0x71 PF: > { %s1460_s17 = sld [smem:[#allocation16_spill]]  ;;  %p628_p3 = scmp.ge.s32.totalorder %s1047_s6, 2 }
  0x73   : > { %p620_p12 = pnand %p628_p3, %p1167_p8 }
  0x75   : > { %p621_p7 = pneg %p620_p12 }
  0x77   : > { %s432_s19 = sand.u32 1, %s1460_s17  }
  0x78   : > { %s433_s3 = scalar_lea.sflag [#allocation4], %s432_s19 }
  0x79   : > { %990 = dma.done.wait (%p621_p7), %s433_s3, 2048  }
  0x7a   : > { %992 = vsyncadd (%p621_p7), %s433_s3, 4294965248  ;;  %s25_s6 = sadd.s32 1, %s1047_s6   ;;  %s1463_s5 = sld [smem:[#allocation17_spill]] }
  0x7b   : > { %p1358_p10 = scmp.ge.s32.totalorder %s25_s6, 6   ;;  %s1464_s21 = sld [smem:[#allocation18_spill]] }
  0x7c   : > { %s1465_s14 = sld [smem:[#allocation26_spill]]  ;;  %s1470_s19 = smov %s1003_s20 }
  0x7d   : > { %s1466_s9 = sld [smem:[#allocation24_spill]]  ;;  %s1471_s20 = smov %s1266_s27 }
  0x7e   : > { %s1467_s12 = sld [smem:[#allocation25_spill]]  ;;  %s1472_s22 = smov %s1015_s23 }
  0x7f   : > { %s1473_s23 = smov %s1263_s15  ;;  %s1474_s24 = smov %s1023_s25 }
  0x80   : > { %s1469_s18 = smov %s1463_s5  ;;  %s1475_s25 = smov %s1027_s26 }
  0x81   : > { %s1477_s27 = smov %s1039_s29  ;;  %s1478_s28 = smov %s1043_s30 }
  0x82   : > { %s1476_s26 = smov %s1465_s14  ;;  %24 = sbr.rel (!%p1358_p10) target bundleno = 18 (0x12), region = 117 }
  0x83   : > { %s1479_s29 = smov %s1466_s9 }
  0x84   : > { %s1480_s30 = smov %s1467_s12 }
  0x87   :  { %439 = vsyncpa [#allocation3], 1 }
  0x88   :  { %441 = vsyncpa [#allocation3 + $0x1], 1 }
  0x89   :  { %442 = vsyncpa [#allocation6], 1 }
  0x8a   :  { %443 = vsyncpa [#allocation9], 1 }
  0x8b   :  { %445 = vsyncpa [#allocation9 + $0x1], 1 }
  0x8c   :  { %446 = vsyncpa [#allocation4], 1 }
  0x8d   :  { %448 = vsyncpa [#allocation4 + $0x1], 1 }

</bundles_post_ra>
